<compile_context>
chip_gen: v7x
topology: tpu7x:2x2x1
jax: 0.10.0
libtpu: 0.0.40
codegen_flags: <defaults>
</compile_context>

<pallas_src>
import functools
import math

import jax
import jax.numpy as jnp
from jax import lax
from jax.experimental import pallas as pl
from jax.experimental.pallas import tpu as pltpu

_LANE = 128


def _round_up(x, m):
    return pl.cdiv(x, m) * m


def _choose_tile(batch, requested):
    """Batch tile: multiple of 128 lanes, large to amortize the ~0.35 us/step grid overhead,
    but keep >= 2 grid steps when the batch allows so v7x's second TC has work."""
    b_aligned = _round_up(batch, _LANE)
    tile = max(_LANE, min(_round_up(requested, _LANE), b_aligned))
    if b_aligned // tile < 2 and b_aligned >= 2 * _LANE:
        tile = _round_up(pl.cdiv(b_aligned, 2), _LANE)
    return tile


def _choose_chunk(tile, requested=512):
    """Inner compute chunk (lane width): <= 512 so the (hidden, chunk) f32 intermediates stay in
    vregs and never spill (v5e has a single vector-store slot per bundle)."""
    chunk = min(tile, requested)
    while tile % chunk:
        chunk -= _LANE
    return max(chunk, _LANE)


def _make_mlp_kernel(reduce_out, chunk, n_chunks):
    """Fused 3-layer MLP over one (tile, coins) batch tile, sub-tiled into `chunk`-lane pieces."""

    def kernel(x_ref, w1_ref, b1_ref, w2_ref, b2_ref, w3_ref, b3_ref, o_ref):
        # Tiny constant-index operands: load once per grid step, stay resident.
        w1 = w1_ref[...]          # (hidden, coins)  bf16
        b1 = b1_ref[...]          # (hidden, 1)      f32
        w2 = w2_ref[...]          # (hidden, hidden) bf16
        b2 = b2_ref[...]          # (hidden, 1)      f32
        w3 = w3_ref[...]          # (hidden, 1) f32  |  (out, hidden) bf16
        b3 = b3_ref[...]          # (out, 1)         f32

        def body(c, carry):
            start = pl.multiple_of(c * chunk, chunk)
            x = x_ref[pl.ds(start, chunk), :]                       # (chunk, coins) bf16
            # Contract the coins axis directly (NT matmul): batch lands on lanes,
            # no wrapper-side transpose / extra HBM pass.
            h1 = lax.dot_general(w1, x, (((1,), (1,)), ((), ())),
                                 preferred_element_type=jnp.float32)  # (hidden, chunk)
            h1 = jnp.maximum(h1 + b1, 0.0)                            # fn() == ReLU

            h2 = jnp.dot(w2, h1.astype(jnp.bfloat16),
                         preferred_element_type=jnp.float32)          # (hidden, chunk)
            h2 = jnp.maximum(h2 + b2, 0.0)                            # fn() == ReLU

            if reduce_out:
                # output_size == 1: an M=1 MXU matmul wastes the systolic array; do a
                # VPU multiply + sublane (XLU) reduce instead -> (1, chunk), lane-dense.
                out = jnp.sum(h2 * w3, axis=0, keepdims=True) + b3
            else:
                # bf16 x bf16 MXU matmul, f32 accumulation (consistent with layers 1-2).
                out = jnp.dot(w3, h2.astype(jnp.bfloat16),
                              preferred_element_type=jnp.float32) + b3

            o_ref[:, pl.ds(start, chunk)] = out.astype(o_ref.dtype)
            return carry

        lax.fori_loop(0, n_chunks, body, 0, unroll=False)

    return kernel


@functools.partial(jax.jit, static_argnames=("block_b",))
def discriminator_forward(throws, params, *, block_b=2048):
    """throws: (B, coins), ideally already bf16 (values are {0,1}, exact).  params: see init."""
    w1t, b1 = params["w1t"], params["b1"]
    w2t, b2 = params["w2t"], params["b2"]
    w3, b3 = params["w3"], params["b3"]

    B, coins = throws.shape
    hidden = w1t.shape[0]
    out_dim = w3.shape[1]

    tile = _choose_tile(B, block_b)
    chunk = _choose_chunk(tile)
    b_pad = _round_up(B, tile)
    grid = (b_pad // tile,)

    x = throws.astype(jnp.bfloat16)            # no-op when the caller already streams bf16
    if b_pad != B:
        x = jnp.pad(x, ((0, b_pad - B), (0, 0)))   # tail rows computed then sliced off

    reduce_out = out_dim == 1
    # (hidden, 1) f32 broadcast operand for the reduce head; (out, hidden) bf16 MXU LHS otherwise.
    w3_arg = w3 if reduce_out else w3.T.astype(jnp.bfloat16)

    out_t = pl.pallas_call(
        _make_mlp_kernel(reduce_out, chunk, tile // chunk),
        out_shape=jax.ShapeDtypeStruct((out_dim, b_pad), jnp.float32),
        grid=grid,
        in_specs=[
            pl.BlockSpec((tile, coins), lambda i: (i, 0)),      # x, natural (B, coins) layout
            pl.BlockSpec((hidden, coins), lambda i: (0, 0)),    # w1^T  (resident in VMEM)
            pl.BlockSpec((hidden, 1), lambda i: (0, 0)),        # b1
            pl.BlockSpec((hidden, hidden), lambda i: (0, 0)),   # w2^T
            pl.BlockSpec((hidden, 1), lambda i: (0, 0)),        # b2
            pl.BlockSpec(w3_arg.shape, lambda i: (0, 0)),       # w3 (layout depends on out_dim)
            pl.BlockSpec((out_dim, 1), lambda i: (0, 0)),       # b3
        ],
        out_specs=pl.BlockSpec((out_dim, tile), lambda i: (0, i)),  # lane-dense output block
        compiler_params=pltpu.CompilerParams(
            dimension_semantics=("parallel",),
        ),
    )(x, w1t, b1, w2t, b2, w3_arg, b3)

    return out_t[:, :B].T  # (B, out_dim) float32


def init_discriminator_params(key, coins, hidden_size, output_size):
    """PyTorch nn.Linear default init: U(-1/sqrt(fan_in), 1/sqrt(fan_in)).

    Kernel-friendly layout:
      w1t: (hidden, coins)  bf16    b1: (hidden, 1) f32
      w2t: (hidden, hidden) bf16    b2: (hidden, 1) f32
      w3 : (hidden, out)    f32     b3: (out, 1)    f32
    """
    k = jax.random.split(key, 6)

    def linear_t(kw, kb, fan_in, fan_out, w_dtype):
        bound = 1.0 / math.sqrt(fan_in)
        w_t = jax.random.uniform(kw, (fan_out, fan_in), jnp.float32, -bound, bound)
        b = jax.random.uniform(kb, (fan_out, 1), jnp.float32, -bound, bound)
        return w_t.astype(w_dtype), b

    w1t, b1 = linear_t(k[0], k[1], coins, hidden_size, jnp.bfloat16)
    w2t, b2 = linear_t(k[2], k[3], hidden_size, hidden_size, jnp.bfloat16)
    w3t, b3 = linear_t(k[4], k[5], hidden_size, output_size, jnp.float32)
    return {"w1t": w1t, "b1": b1, "w2t": w2t, "b2": b2, "w3": w3t.T, "b3": b3}


def _reference_forward(throws, params):
    """Pure-JAX reference with the same bf16-in / f32-accumulate precision as the kernel."""
    x = throws.astype(jnp.bfloat16)
    h1 = jnp.dot(x, params["w1t"].T, preferred_element_type=jnp.float32) + params["b1"].T
    h1 = jnp.maximum(h1, 0.0)
    h2 = jnp.dot(h1.astype(jnp.bfloat16), params["w2t"].T,
                 preferred_element_type=jnp.float32) + params["b2"].T
    h2 = jnp.maximum(h2, 0.0)
    out_dim = params["w3"].shape[1]
    if out_dim == 1:
        return jnp.dot(h2, params["w3"], preferred_element_type=jnp.float32) + params["b3"].T
    return jnp.dot(h2.astype(jnp.bfloat16), params["w3"].astype(jnp.bfloat16),
                   preferred_element_type=jnp.float32) + params["b3"].T


if __name__ == "__main__":
    coins, hidden_size, output_size = 16, 32, 1
    batch = 1000  # exercises tail padding (pad to 1024) and a 2-step "parallel" grid

    key = jax.random.PRNGKey(0)
    k_params, k_x = jax.random.split(key)

    params = init_discriminator_params(k_params, coins, hidden_size, output_size)
    # "throws": Bernoulli coin-flip outcomes in {0, 1} -- generated directly as bf16 (exact),
    # halving the streamed input bytes vs f32.
    throws = jax.random.bernoulli(k_x, 0.5, (batch, coins)).astype(jnp.bfloat16)

    out = discriminator_forward(throws, params, block_b=2048)
    out = jax.block_until_ready(out)

    ref = _reference_forward(throws, params)
    assert out.shape == (batch, output_size)
    assert jnp.allclose(out, ref, atol=1e-3, rtol=1e-3), "Pallas kernel mismatch vs reference"

    print("KERNEL_OK")
</pallas_src>

<mosaic_0001>
module attributes {stable_mosaic.version = 11 : i64} {
  func.func @kernel(%arg0: i32, %arg1: memref<512x16xbf16, #tpu.memory_space<vmem>>, %arg2: memref<32x16xbf16, #tpu.memory_space<vmem>>, %arg3: memref<32x1xf32, #tpu.memory_space<vmem>>, %arg4: memref<32x32xbf16, #tpu.memory_space<vmem>>, %arg5: memref<32x1xf32, #tpu.memory_space<vmem>>, %arg6: memref<32x1xf32, #tpu.memory_space<vmem>>, %arg7: memref<1x1xf32, #tpu.memory_space<vmem>>, %arg8: memref<1x512xf32, #tpu.memory_space<vmem>>) attributes {dimension_semantics = [#tpu.dimension_semantics<parallel>], iteration_bounds = array<i64: 2>, scalar_prefetch = 0 : i64, scratch_operands = 0 : i64, tpu.core_type = #tpu.core_type<tc>, window_params = [{transform_indices = @transform_0, window_bounds = array<i64: 512, 16>}, {pipeline_mode = #tpu.pipeline_mode<synchronous>, transform_indices = @transform_1, window_bounds = array<i64: 32, 16>}, {pipeline_mode = #tpu.pipeline_mode<synchronous>, transform_indices = @transform_2, window_bounds = array<i64: 32, 1>}, {pipeline_mode = #tpu.pipeline_mode<synchronous>, transform_indices = @transform_3, window_bounds = array<i64: 32, 32>}, {pipeline_mode = #tpu.pipeline_mode<synchronous>, transform_indices = @transform_4, window_bounds = array<i64: 32, 1>}, {pipeline_mode = #tpu.pipeline_mode<synchronous>, transform_indices = @transform_5, window_bounds = array<i64: 32, 1>}, {pipeline_mode = #tpu.pipeline_mode<synchronous>, transform_indices = @transform_6, window_bounds = array<i64: 1, 1>}, {transform_indices = @transform_7, window_bounds = array<i64: 1, 512>}]} {
    %c0 = arith.constant 0 : index
    %c0_0 = arith.constant 0 : index
    %0 = vector.load %arg2[%c0, %c0_0] : memref<32x16xbf16, #tpu.memory_space<vmem>>, vector<32x16xbf16>
    %c0_1 = arith.constant 0 : index
    %c0_2 = arith.constant 0 : index
    %1 = vector.load %arg3[%c0_1, %c0_2] : memref<32x1xf32, #tpu.memory_space<vmem>>, vector<32x1xf32>
    %c0_3 = arith.constant 0 : index
    %c0_4 = arith.constant 0 : index
    %2 = vector.load %arg4[%c0_3, %c0_4] : memref<32x32xbf16, #tpu.memory_space<vmem>>, vector<32x32xbf16>
    %c0_5 = arith.constant 0 : index
    %c0_6 = arith.constant 0 : index
    %3 = vector.load %arg5[%c0_5, %c0_6] : memref<32x1xf32, #tpu.memory_space<vmem>>, vector<32x1xf32>
    %c0_7 = arith.constant 0 : index
    %c0_8 = arith.constant 0 : index
    %4 = vector.load %arg6[%c0_7, %c0_8] : memref<32x1xf32, #tpu.memory_space<vmem>>, vector<32x1xf32>
    %c0_9 = arith.constant 0 : index
    %c0_10 = arith.constant 0 : index
    %5 = vector.load %arg7[%c0_9, %c0_10] : memref<1x1xf32, #tpu.memory_space<vmem>>, vector<1x1xf32>
    %c0_i32 = arith.constant 0 : i32
    %c512_i32 = arith.constant 512 : i32
    %6 = arith.muli %c0_i32, %c512_i32 : i32
    %7 = tpu.assume_multiple %6, 512 : i32
    %8 = arith.index_cast %7 : i32 to index
    %c0_11 = arith.constant 0 : index
    %9 = vector.load %arg1[%8, %c0_11] : memref<512x16xbf16, #tpu.memory_space<vmem>>, vector<512x16xbf16>
    %cst = arith.constant dense<0.000000e+00> : vector<32x512xf32>
    %10 = tpu.matmul %0, %9, %cst {dimension_numbers = #tpu.dot_dimension_numbers<[1], [1], [0], [0], [0, 0, 1, 0], [], []>} : vector<32x16xbf16>, vector<512x16xbf16>, vector<32x512xf32> -> vector<32x512xf32>
    %11 = vector.broadcast %1 : vector<32x1xf32> to vector<32x512xf32>
    %12 = arith.addf %10, %11 : vector<32x512xf32>
    %cst_12 = arith.constant 0.000000e+00 : f32
    %13 = vector.broadcast %cst_12 : f32 to vector<32x512xf32>
    %14 = arith.maximumf %12, %13 : vector<32x512xf32>
    %15 = arith.truncf %14 : vector<32x512xf32> to vector<32x512xbf16>
    %cst_13 = arith.constant dense<0.000000e+00> : vector<32x512xf32>
    %16 = tpu.matmul %2, %15, %cst_13 {dimension_numbers = #tpu.dot_dimension_numbers<[1], [0], [0], [1], [0, 0, 1, 1], [], []>} : vector<32x32xbf16>, vector<32x512xbf16>, vector<32x512xf32> -> vector<32x512xf32>
    %17 = vector.broadcast %3 : vector<32x1xf32> to vector<32x512xf32>
    %18 = arith.addf %16, %17 : vector<32x512xf32>
    %cst_14 = arith.constant 0.000000e+00 : f32
    %19 = vector.broadcast %cst_14 : f32 to vector<32x512xf32>
    %20 = arith.maximumf %18, %19 : vector<32x512xf32>
    %21 = vector.broadcast %4 : vector<32x1xf32> to vector<32x512xf32>
    %22 = arith.mulf %20, %21 : vector<32x512xf32>
    %cst_15 = arith.constant dense<0.000000e+00> : vector<512xf32>
    %23 = vector.multi_reduction <add>, %22, %cst_15 [0] : vector<32x512xf32> to vector<512xf32>
    %24 = vector.shape_cast %23 : vector<512xf32> to vector<1x512xf32>
    %25 = vector.broadcast %5 : vector<1x1xf32> to vector<1x512xf32>
    %26 = arith.addf %24, %25 : vector<1x512xf32>
    %c0_16 = arith.constant 0 : index
    %27 = arith.index_cast %7 : i32 to index
    %28 = vector.load %arg8[%c0_16, %27] : memref<1x512xf32, #tpu.memory_space<vmem>>, vector<1x512xf32>
    tpu.vector_store %arg8[%c0_16, %27], %26 {strides = array<i32>} : memref<1x512xf32, #tpu.memory_space<vmem>>, vector<1x512xf32>,
    %c1_i32 = arith.constant 1 : i32
    return
  }
  func.func @transform_0(%arg0: i32) -> (i32, i32) {
    %c0_i32 = arith.constant 0 : i32
    %c0_i32_0 = arith.constant 0 : i32
    return %arg0, %c0_i32 : i32, i32
  }
  func.func @transform_1(%arg0: i32) -> (i32, i32) {
    %c0_i32 = arith.constant 0 : i32
    %c0_i32_0 = arith.constant 0 : i32
    %c0_i32_1 = arith.constant 0 : i32
    return %c0_i32, %c0_i32_0 : i32, i32
  }
  func.func @transform_2(%arg0: i32) -> (i32, i32) {
    %c0_i32 = arith.constant 0 : i32
    %c0_i32_0 = arith.constant 0 : i32
    %c0_i32_1 = arith.constant 0 : i32
    return %c0_i32, %c0_i32_0 : i32, i32
  }
  func.func @transform_3(%arg0: i32) -> (i32, i32) {
    %c0_i32 = arith.constant 0 : i32
    %c0_i32_0 = arith.constant 0 : i32
    %c0_i32_1 = arith.constant 0 : i32
    return %c0_i32, %c0_i32_0 : i32, i32
  }
  func.func @transform_4(%arg0: i32) -> (i32, i32) {
    %c0_i32 = arith.constant 0 : i32
    %c0_i32_0 = arith.constant 0 : i32
    %c0_i32_1 = arith.constant 0 : i32
    return %c0_i32, %c0_i32_0 : i32, i32
  }
  func.func @transform_5(%arg0: i32) -> (i32, i32) {
    %c0_i32 = arith.constant 0 : i32
    %c0_i32_0 = arith.constant 0 : i32
    %c0_i32_1 = arith.constant 0 : i32
    return %c0_i32, %c0_i32_0 : i32, i32
  }
  func.func @transform_6(%arg0: i32) -> (i32, i32) {
    %c0_i32 = arith.constant 0 : i32
    %c0_i32_0 = arith.constant 0 : i32
    %c0_i32_1 = arith.constant 0 : i32
    return %c0_i32, %c0_i32_0 : i32, i32
  }
  func.func @transform_7(%arg0: i32) -> (i32, i32) {
    %c0_i32 = arith.constant 0 : i32
    %c0_i32_0 = arith.constant 0 : i32
    return %c0_i32, %arg0 : i32, i32
  }
}

</mosaic_0001>

<bundles_post_ra>
// kernel: discriminator_forward.1
= control target key start
LH: loop header
LB: loop body
LE: loop exit
PB: predicated region body
PF: predicated region fallthrough
CT: control target
= control target key end

     0   :  { %s1330_s26 = smov 0   ;;  %s1485_s0 = inlined_call_operand.vmem [shape: bf16[1024,16], index: 0, kind: input, shape index: {}]   ;;  %s1486_s1 = inlined_call_operand.vmem [shape: bf16[32,16], index: 1, kind: input, shape index: {}]   ;;  %s1487_s2 = inlined_call_operand.vmem [shape: f32[32,1], index: 2, kind: input, shape index: {}]   ;;  %s1488_s3 = inlined_call_operand.vmem [shape: bf16[32,32], index: 3, kind: input, shape index: {}]   ;;  %s1489_s4 = inlined_call_operand.vmem [shape: f32[32,1], index: 4, kind: input, shape index: {}]   ;;  %s1490_s5 = inlined_call_operand.vmem [shape: f32[32,1], index: 5, kind: input, shape index: {}]   ;;  %s1491_s6 = inlined_call_operand.<no memory space> [shape: f32[1,1], index: 6, kind: input, shape index: {}]   ;;  %s1492_s7 = inlined_call_operand.vmem [shape: f32[1,1024], index: 7, kind: output, shape index: {}]  }
   0x1   :  { %v12_v0 = vstv %s1491_s6 }
   0x2   :  { %13 = vst [vmem:[#allocation2] sm:$0x1] %v12_v0 }
   0x3 LB: > { %s1119_s27 = sadd.s32 4294967295, %s1283_s26   ;;  %p1123_p0 = scmp.ge.s32.totalorder %s1283_s26, 1  ;;  %s1283_s26 = sphi %s1330_s26, %s19_s26  }
   0x4   : > { %p240_p1 = scmp.lt.s32.totalorder %s1283_s26, 3 }
   0x6   : > { %p241_p2 = pnand %p1123_p0, %p240_p1 }
   0x7   : > { %s1124_s28 = sshll.u32 (!%p241_p2), %s1119_s27, 6  ;;  %v1343_v1 = vld [vmem:[%s1486_s1] sm:$0xff] (!%p241_p2)   ;;  %vm558_vm0 = vcmask (!%p241_p2), 130048   ;;  %v289_v3 = vld [vmem:[%s1487_s2 + $0x10] sm:$0xff] (!%p241_p2)  ;;  %v1285_v4 = vmov (!%p241_p2), 0   ;;  %v288_v5 = vld [vmem:[%s1487_s2 + $0x8] sm:$0xff] (!%p241_p2) }
   0x8   : > { %244 = sbr.rel (%p241_p2) target bundleno = 573 (0x23d), region = 48  ;;  %p272_p3 = scmp.lt.s32.totalorder (!%p241_p2), %s1124_s28, 127  ;;  %v287_v2 = vld [vmem:[%s1487_s2] sm:$0xff] (!%p241_p2)  ;;  %1189 = vmatprep.mubr.msk.bf16.mxu0 (!%p241_p2), %vm558_vm0, %v1343_v1  ;;  %1209 = vmatprep.mubr.msk.bf16.mxu1 (!%p241_p2), %vm558_vm0, %v1343_v1  ;;  %v290_v6 = vld [vmem:[%s1487_s2 + $0x18] sm:$0xff] (!%p241_p2)  ;;  %v296_v12 = vld [vmem:[%s1489_s4 + $0x8] sm:$0xff] (!%p241_p2)  ;;  %vm821_vm1 = vcmask (!%p241_p2), 261120  }
   0x9   : > { %1239 = vset.pattern.permute.xlu0 (!%p241_p2), %v1285_v4  ;;  %1240 = vset.pattern.permute.xlu1 (!%p241_p2), %v1285_v4  ;;  %v295_v10 = vld [vmem:[%s1489_s4] sm:$0xff] (!%p241_p2)  ;;  %v297_v19 = vld [vmem:[%s1489_s4 + $0x10] sm:$0xff] (!%p241_p2)  ;;  %v298_v20 = vld [vmem:[%s1489_s4 + $0x18] sm:$0xff] (!%p241_p2)  ;;  %s1126_s19 = sshll.u32 (!%p241_p2), %s1119_s27, 2 }
   0xa   : > { %370 = vperm.xlu0 (!%p241_p2), %1239, %v287_v2   ;;  %380 = vperm.xlu1 (!%p241_p2), %1240, %v289_v3   ;;  %v299_v25 = vld [vmem:[%s1490_s5] sm:$0xff] (!%p241_p2)  ;;  %v300_v26 = vld [vmem:[%s1490_s5 + $0x8] sm:$0xff] (!%p241_p2)  ;;  %v301_v29 = vld [vmem:[%s1490_s5 + $0x10] sm:$0xff] (!%p241_p2)  ;;  %p278_p4 = scmp.lt.s32.totalorder (!%p241_p2), %s1126_s19, 7 }
   0xb   : > { %v302_v30 = vld [vmem:[%s1490_s5 + $0x18] sm:$0xff] (!%p241_p2)  ;;  %v303_v35 = vld [vmem:[#allocation2] sm:$0x1] (!%p241_p2)  ;;  %v1274_v0 = vld [vmem:[%s1486_s1 + $0x8] sm:$0xff] (!%p241_p2)  }
   0xe   : > { %375 = vperm.xlu0 (!%p241_p2), %1239, %v288_v5   ;;  %385 = vperm.xlu1 (!%p241_p2), %1240, %v290_v6  }
   0xf   : > { %s1494_s28 = smov (!%p272_p3, %s1124_s28), 127  ;;  %s1496_s19 = smov (!%p278_p4, %s1126_s19), 7 }
  0x10   : > { %s1125_s11 = sshll.u32 %s1494_s28, 2  ;;  %s280_s27 = scalar_lea.vmem %s1492_s7, %s1496_s19 }
  0x11   : > { %s1360_s14 = scalar_lea.vmem %s1485_s0, %s1125_s11 }
  0x12   : > { %v1241_v7 = vld [vmem:[%s1360_s14 + $0x40] sm:$0xff]   ;;  %v1245_v14 = vld [vmem:[%s1360_s14 + $0x48] sm:$0xff]   ;;  %793 = vperm.xlu0 %1239, %v295_v10   ;;  %798 = vperm.xlu1 %1240, %v296_v12   ;;  %v1249_v22 = vld [vmem:[%s1360_s14 + $0x50] sm:$0xff]  }
  0x13   : > { %v1242_v8 = vld [vmem:[%s1360_s14 + $0xc0] sm:$0xff]   ;;  %1213 = vmatprep.subr.msk.bf16.mxu0 %vm558_vm0, %v1241_v7  ;;  %v1246_v16 = vld [vmem:[%s1360_s14 + $0xc8] sm:$0xff]   ;;  %v1250_v24 = vld [vmem:[%s1360_s14 + $0xd0] sm:$0xff]  }
  0x14   : > { %v1243_v9 = vld [vmem:[%s1360_s14] sm:$0xff]   ;;  %1221 = vmatprep.subr.msk.bf16.mxu1 %vm558_vm0, %v1242_v8  ;;  %v1247_v17 = vld [vmem:[%s1360_s14 + $0x8] sm:$0xff]   ;;  %v1251_v27 = vld [vmem:[%s1360_s14 + $0x10] sm:$0xff]  }
  0x15   : > { %v1244_v11 = vld [vmem:[%s1360_s14 + $0x80] sm:$0xff]   ;;  %v566_v13 = vsel %vm558_vm0, %v1243_v9, 0  ;;  %v1248_v18 = vld [vmem:[%s1360_s14 + $0x88] sm:$0xff]   ;;  %v569_v21 = vsel %vm558_vm0, %v1247_v17, 0  ;;  %v1252_v28 = vld [vmem:[%s1360_s14 + $0x90] sm:$0xff]   ;;  %v572_v31 = vsel %vm558_vm0, %v1251_v27, 0 }
  0x16   : > { %1174 = vmatpush3.bf16.xpose.msra.mxu0 %v566_v13  ;;  %v614_v15 = vsel %vm558_vm0, %v1244_v11, 0  ;;  %v617_v23 = vsel %vm558_vm0, %v1248_v18, 0  ;;  %803 = vperm.xlu0 %1239, %v297_v19   ;;  %v1253_v32 = vld [vmem:[%s1360_s14 + $0x58] sm:$0xff]   ;;  %v620_v33 = vsel %vm558_vm0, %v1252_v28, 0  ;;  %v1257_v39 = vld [vmem:[%s1360_s14 + $0x60] sm:$0xff]   ;;  %v1261_v45 = vld [vmem:[%s1360_s14 + $0x68] sm:$0xff]  }
  0x17   : > { %1194 = vmatpush3.bf16.xpose.msra.mxu1 %v614_v15  ;;  %1214 = vmatprep.subr.msk.bf16.mxu0 %vm558_vm0, %v1245_v14  ;;  %v1254_v34 = vld [vmem:[%s1360_s14 + $0xd8] sm:$0xff]   ;;  %v1258_v41 = vld [vmem:[%s1360_s14 + $0xe0] sm:$0xff]   ;;  %v1262_v47 = vld [vmem:[%s1360_s14 + $0xe8] sm:$0xff]  }
  0x18   : > { %1222 = vmatprep.subr.msk.bf16.mxu1 %vm558_vm0, %v1246_v16  ;;  %808 = vperm.xlu1 %1240, %v298_v20   ;;  %v1255_v36 = vld [vmem:[%s1360_s14 + $0x18] sm:$0xff]   ;;  %v1259_v42 = vld [vmem:[%s1360_s14 + $0x20] sm:$0xff]   ;;  %v1263_v48 = vld [vmem:[%s1360_s14 + $0x28] sm:$0xff]  }
  0x19   : > { %v1256_v37 = vld [vmem:[%s1360_s14 + $0x98] sm:$0xff]   ;;  %v575_v38 = vsel %vm558_vm0, %v1255_v36, 0  ;;  %v1260_v43 = vld [vmem:[%s1360_s14 + $0xa0] sm:$0xff]   ;;  %v578_v44 = vsel %vm558_vm0, %v1259_v42, 0  ;;  %v1264_v49 = vld [vmem:[%s1360_s14 + $0xa8] sm:$0xff]   ;;  %v581_v50 = vsel %vm558_vm0, %v1263_v48, 0 }
  0x1a   : > { %952 = vperm.xlu0 %1239, %v299_v25   ;;  %v623_v40 = vsel %vm558_vm0, %v1256_v37, 0  ;;  %v626_v46 = vsel %vm558_vm0, %v1260_v43, 0  ;;  %v1265_v51 = vld [vmem:[%s1360_s14 + $0x70] sm:$0xff]   ;;  %v629_v52 = vsel %vm558_vm0, %v1264_v49, 0  ;;  %v1269_v57 = vld [vmem:[%s1360_s14 + $0x78] sm:$0xff]  }
  0x1b   : > { %v1266_v53 = vld [vmem:[%s1360_s14 + $0xf0] sm:$0xff]   ;;  %v1270_v59 = vld [vmem:[%s1360_s14 + $0xf8] sm:$0xff]  }
  0x1c   : > { %957 = vperm.xlu1 %1240, %v300_v26   ;;  %v1267_v54 = vld [vmem:[%s1360_s14 + $0x30] sm:$0xff]   ;;  %v1271_v60 = vld [vmem:[%s1360_s14 + $0x38] sm:$0xff]  }
  0x1d   : > { %v1268_v55 = vld [vmem:[%s1360_s14 + $0xb0] sm:$0xff]   ;;  %v584_v56 = vsel %vm558_vm0, %v1267_v54, 0  ;;  %v1272_v61 = vld [vmem:[%s1360_s14 + $0xb8] sm:$0xff]   ;;  %v587_v62 = vsel %vm558_vm0, %v1271_v60, 0 }
  0x1e   : > { %1176 = vmatpush3.bf16.xpose.msra.mxu0 %v569_v21  ;;  %962 = vperm.xlu0 %1239, %v301_v29   ;;  %v632_v58 = vsel %vm558_vm0, %v1268_v55, 0  ;;  %v635_v63 = vsel %vm558_vm0, %v1272_v61, 0 }
  0x1f   : > { %1196 = vmatpush3.bf16.xpose.msra.mxu1 %v617_v23  ;;  %1215 = vmatprep.subr.msk.bf16.mxu0 %vm558_vm0, %v1249_v22 }
  0x20   : > { %1223 = vmatprep.subr.msk.bf16.mxu1 %vm558_vm0, %v1250_v24  ;;  %967 = vperm.xlu1 %1240, %v302_v30  }
  0x22   : > { %1024 = vperm.xlu0 %1239, %v303_v35  }
  0x26   : > { %1178 = vmatpush3.bf16.xpose.msra.mxu0 %v572_v31 }
  0x27   : > { %1198 = vmatpush3.bf16.xpose.msra.mxu1 %v620_v33  ;;  %1216 = vmatprep.subr.msk.bf16.mxu0 %vm558_vm0, %v1253_v32 }
  0x28   : > { %1224 = vmatprep.subr.msk.bf16.mxu1 %vm558_vm0, %v1254_v34 }
  0x2e   : > { %1180 = vmatpush3.bf16.xpose.msra.mxu0 %v575_v38 }
  0x2f   : > { %1200 = vmatpush3.bf16.xpose.msra.mxu1 %v623_v40  ;;  %1217 = vmatprep.subr.msk.bf16.mxu0 %vm558_vm0, %v1257_v39 }
  0x30   : > { %1225 = vmatprep.subr.msk.bf16.mxu1 %vm558_vm0, %v1258_v41 }
  0x36   : > { %1182 = vmatpush3.bf16.xpose.msra.mxu0 %v578_v44 }
  0x37   : > { %1202 = vmatpush3.bf16.xpose.msra.mxu1 %v626_v46  ;;  %1218 = vmatprep.subr.msk.bf16.mxu0 %vm558_vm0, %v1261_v45 }
  0x38   : > { %1226 = vmatprep.subr.msk.bf16.mxu1 %vm558_vm0, %v1262_v47 }
  0x3e   : > { %1184 = vmatpush3.bf16.xpose.msra.mxu0 %v581_v50 }
  0x3f   : > { %1204 = vmatpush3.bf16.xpose.msra.mxu1 %v629_v52  ;;  %1219 = vmatprep.subr.msk.bf16.mxu0 %vm558_vm0, %v1265_v51 }
  0x40   : > { %1227 = vmatprep.subr.msk.bf16.mxu1 %vm558_vm0, %v1266_v53 }
  0x46   : > { %1186 = vmatpush3.bf16.xpose.msra.mxu0 %v584_v56 }
  0x47   : > { %1206 = vmatpush3.bf16.xpose.msra.mxu1 %v632_v58  ;;  %1220 = vmatprep.subr.msk.bf16.mxu0 %vm558_vm0, %v1269_v57 }
  0x48   : > { %1228 = vmatprep.subr.msk.bf16.mxu1 %vm558_vm0, %v1270_v59 }
  0x4e   : > { %1188 = vmatpush3.bf16.xpose.msra.mxu0 %v587_v62  ;;  %v1275_v62 = vld [vmem:[%s1488_s3] sm:$0xff]  }
  0x4f   : > { %1208 = vmatpush3.bf16.xpose.msra.mxu1 %v635_v63  ;;  %v1276_v63 = vld [vmem:[%s1488_s3 + $0x8] sm:$0xff]  }
  0x55   : > { %1190 = vmatmul.mubr.msk.bf16.vlgmr.msra.gmra.mrb[0].mxu0 %vm558_vm0, %v1343_v1 }
  0x56   : > { %1210 = vmatmul.mubr.msk.bf16.vlgmr.msra.gmra.mrb[0].mxu1 %vm558_vm0, %v1343_v1  ;;  %1191 = vmatprep.mubr.msk.bf16.mxu0 %vm558_vm0, %v1274_v0 }
  0x57   : > { %1211 = vmatprep.mubr.msk.bf16.mxu1 %vm558_vm0, %v1274_v0 }
  0x5d   : > { %1192 = vmatmul.mubr.msk.bf16.gmra.mrb[4].mxu0 %vm558_vm0, %v1274_v0 }
  0x5e   : > { %1212 = vmatmul.mubr.msk.bf16.gmra.mrb[4].mxu1 %vm558_vm0, %v1274_v0  ;;  %860 = vmatprep.mubr.bf16.mxu0 %v1285_v4 }
  0x5f   : > { %913 = vmatprep.mubr.bf16.mxu1 %v1285_v4 }
  0x89   : > { %v371_v2 = vpop.permute.xlu0 %370  ;;  %v381_v3 = vpop.permute.xlu1 %380 }
  0x8d   : > { %v376_v5 = vpop.permute.xlu0 %375  ;;  %v386_v30 = vpop.permute.xlu1 %385 }
  0x91   : > { %v794_v0 = vpop.permute.xlu0 %793 }
 0x128   : > { %v695_v6 = vpop.f32.mrb[0].mxu0 }
 0x129   : > { %v696_v7 = vadd.f32 %v695_v6, %v371_v2  ;;  %v748_v8 = vpop.f32.mrb[0].mxu1  ;;  %v697_v9 = vpop.f32.mrb[1].mxu0 }
 0x12a   : > { %v749_v1 = vadd.f32 %v748_v8, %v371_v2  ;;  %v698_v10 = vadd.f32 %v697_v9, %v371_v2  ;;  %v750_v11 = vpop.f32.mrb[1].mxu1  ;;  %v699_v12 = vpop.f32.mrb[2].mxu0 }
 0x12b   : > { %v751_v13 = vadd.f32 %v750_v11, %v371_v2  ;;  %v700_v14 = vadd.f32 %v699_v12, %v376_v5  ;;  %v752_v15 = vpop.f32.mrb[2].mxu1  ;;  %v701_v16 = vpop.f32.mrb[3].mxu0  ;;  %v767_v20 = vmax.f32 %v696_v7, 0.0 }
 0x12c   : > { %v753_v17 = vadd.f32 %v752_v15, %v376_v5  ;;  %v702_v18 = vadd.f32 %v701_v16, %v376_v5  ;;  %v754_v19 = vpop.f32.mrb[3].mxu1  ;;  %v769_v23 = vmax.f32 %v749_v1, 0.0  ;;  %v768_v24 = vmax.f32 %v698_v10, 0.0  ;;  %v799_v2 = vpop.permute.xlu1 %798 }
 0x12d   : > { %v771_v21 = vmax.f32 %v700_v14, 0.0  ;;  %v755_v22 = vadd.f32 %v754_v19, %v376_v5  ;;  %v770_v27 = vmax.f32 %v751_v13, 0.0 }
 0x12e   : > { %v773_v25 = vmax.f32 %v753_v17, 0.0  ;;  %v772_v26 = vmax.f32 %v702_v18, 0.0 }
 0x12f   : > { %v783_v28 = vpack.c.bf16 %v771_v21, %v767_v20  ;;  %v774_v29 = vmax.f32 %v755_v22, 0.0 }
 0x130   : > { %v785_v31 = vpack.c.bf16 %v773_v25, %v769_v23  ;;  %v784_v32 = vpack.c.bf16 %v772_v26, %v768_v24  ;;  %v705_v33 = vpop.f32.mrb[4].mxu0  ;;  %v809_v5 = vpop.permute.xlu1 %808 }
 0x131   : > { %v786_v34 = vpack.c.bf16 %v774_v29, %v770_v27  ;;  %v706_v35 = vadd.f32 %v705_v33, %v381_v3  ;;  %v758_v36 = vpop.f32.mrb[4].mxu1  ;;  %v707_v37 = vpop.f32.mrb[5].mxu0 }
 0x132   : > { %v759_v38 = vadd.f32 %v758_v36, %v381_v3  ;;  %v708_v39 = vadd.f32 %v707_v37, %v381_v3  ;;  %v760_v40 = vpop.f32.mrb[5].mxu1  ;;  %v709_v41 = vpop.f32.mrb[6].mxu0  ;;  %828 = vmatprep.subr.bf16.mxu0 %v784_v32 }
 0x133   : > { %v761_v42 = vadd.f32 %v760_v40, %v381_v3  ;;  %v710_v43 = vadd.f32 %v709_v41, %v386_v30  ;;  %v762_v44 = vpop.f32.mrb[6].mxu1  ;;  %881 = vmatprep.subr.bf16.mxu1 %v786_v34  ;;  %v711_v45 = vpop.f32.mrb[7].mxu0  ;;  %829 = vmatpush1.bf16.msra.mxu0 %v783_v28  ;;  %v775_v49 = vmax.f32 %v706_v35, 0.0 }
 0x134   : > { %v763_v46 = vadd.f32 %v762_v44, %v386_v30  ;;  %v712_v47 = vadd.f32 %v711_v45, %v386_v30  ;;  %v764_v48 = vpop.f32.mrb[7].mxu1  ;;  %882 = vmatpush1.bf16.msra.mxu1 %v785_v31  ;;  %v777_v52 = vmax.f32 %v759_v38, 0.0  ;;  %v776_v53 = vmax.f32 %v708_v39, 0.0  ;;  %v804_v3 = vpop.permute.xlu0 %803 }
 0x135   : > { %v779_v50 = vmax.f32 %v710_v43, 0.0  ;;  %v765_v51 = vadd.f32 %v764_v48, %v386_v30  ;;  %v778_v56 = vmax.f32 %v761_v42, 0.0  ;;  %v958_v26 = vpop.permute.xlu1 %957 }
 0x136   : > { %v781_v54 = vmax.f32 %v763_v46, 0.0  ;;  %v780_v55 = vmax.f32 %v712_v47, 0.0 }
 0x137   : > { %v787_v57 = vpack.c.bf16 %v779_v50, %v775_v49  ;;  %v782_v58 = vmax.f32 %v765_v51, 0.0 }
 0x138   : > { %v789_v59 = vpack.c.bf16 %v781_v54, %v777_v52  ;;  %v788_v60 = vpack.c.bf16 %v780_v55, %v776_v53  ;;  %v953_v25 = vpop.permute.xlu0 %952 }
 0x139   : > { %v790_v61 = vpack.c.bf16 %v782_v58, %v778_v56 }
 0x13a   : > { %830 = vmatprep.subr.bf16.mxu0 %v788_v60 }
 0x13b   : > { %883 = vmatprep.subr.bf16.mxu1 %v790_v61  ;;  %831 = vmatpush1.bf16.msra.mxu0 %v787_v57 }
 0x13c   : > { %884 = vmatpush1.bf16.msra.mxu1 %v789_v59  ;;  %v963_v55 = vpop.permute.xlu0 %962 }
 0x13e   : > { %1167 = vmatmul.mubr.msk.bf16.vlgmr.msra.gmra.mrb[8].mxu0 %vm821_vm1, %v1275_v62 }
 0x13f   : > { %1169 = vmatmul.mubr.msk.bf16.vlgmr.msra.gmra.mrb[8].mxu1 %vm821_vm1, %v1275_v62  ;;  %870 = vmatprep.mubr.bf16.mxu0 %v1285_v4 }
 0x140   : > { %923 = vmatprep.mubr.bf16.mxu1 %v1285_v4 }
 0x146   : > { %1168 = vmatmul.mubr.msk.bf16.gmra.mrb[12].mxu0 %vm821_vm1, %v1276_v63 }
 0x147   : > { %1170 = vmatmul.mubr.msk.bf16.gmra.mrb[12].mxu1 %vm821_vm1, %v1276_v63 }
 0x211   : > { %v862_v6 = vpop.f32.mrb[8].mxu0 }
 0x212   : > { %v863_v7 = vadd.f32 %v862_v6, %v794_v0  ;;  %v915_v8 = vpop.f32.mrb[8].mxu1  ;;  %v864_v9 = vpop.f32.mrb[9].mxu0 }
 0x213   : > { %v916_v1 = vadd.f32 %v915_v8, %v794_v0  ;;  %v865_v10 = vadd.f32 %v864_v9, %v794_v0  ;;  %v917_v11 = vpop.f32.mrb[9].mxu1  ;;  %v866_v12 = vpop.f32.mrb[10].mxu0 }
 0x214   : > { %v934_v13 = vmax.f32 %v863_v7, 0.0  ;;  %v918_v4 = vadd.f32 %v917_v11, %v794_v0  ;;  %v867_v14 = vadd.f32 %v866_v12, %v799_v2  ;;  %v919_v15 = vpop.f32.mrb[10].mxu1  ;;  %v868_v16 = vpop.f32.mrb[11].mxu0 }
 0x215   : > { %v936_v17 = vmax.f32 %v916_v1, 0.0  ;;  %v935_v18 = vmax.f32 %v865_v10, 0.0  ;;  %v920_v19 = vadd.f32 %v919_v15, %v799_v2  ;;  %v869_v20 = vadd.f32 %v868_v16, %v799_v2  ;;  %v921_v21 = vpop.f32.mrb[11].mxu1 }
 0x216   : > { %v937_v22 = vmax.f32 %v918_v4, 0.0  ;;  %v938_v23 = vmax.f32 %v867_v14, 0.0  ;;  %v922_v24 = vadd.f32 %v921_v21, %v799_v2  ;;  %v970_v29 = vmul.f32 %v953_v25, %v934_v13  ;;  %v968_v2 = vpop.permute.xlu1 %967 }
 0x217   : > { %v940_v27 = vmax.f32 %v920_v19, 0.0  ;;  %v939_v28 = vmax.f32 %v869_v20, 0.0  ;;  %v972_v32 = vmul.f32 %v953_v25, %v936_v17  ;;  %v971_v33 = vmul.f32 %v953_v25, %v935_v18 }
 0x218   : > { %v974_v30 = vmul.f32 %v958_v26, %v938_v23  ;;  %v941_v31 = vmax.f32 %v922_v24, 0.0  ;;  %v973_v37 = vmul.f32 %v953_v25, %v937_v22  ;;  %v1027_v15 = vlaneseq }
 0x219   : > { %v976_v34 = vmul.f32 %v958_v26, %v940_v27  ;;  %v975_v35 = vmul.f32 %v958_v26, %v939_v28  ;;  %v872_v36 = vpop.f32.mrb[12].mxu0 }
 0x21a   : > { %v986_v38 = vadd.f32 %v974_v30, %v970_v29  ;;  %v977_v39 = vmul.f32 %v958_v26, %v941_v31  ;;  %v873_v40 = vadd.f32 %v872_v36, %v804_v3  ;;  %v925_v41 = vpop.f32.mrb[12].mxu1  ;;  %v874_v42 = vpop.f32.mrb[13].mxu0  ;;  %v1028_v24 = vshrl.u32 %v1027_v15, 7 }
 0x21b   : > { %v1004_v43 = vadd.f32 %v976_v34, %v972_v32  ;;  %v995_v44 = vadd.f32 %v975_v35, %v971_v33  ;;  %v926_v45 = vadd.f32 %v925_v41, %v804_v3  ;;  %v875_v46 = vadd.f32 %v874_v42, %v804_v3  ;;  %v927_v47 = vpop.f32.mrb[13].mxu1  ;;  %v876_v48 = vpop.f32.mrb[14].mxu0 }
 0x21c   : > { %v1013_v49 = vadd.f32 %v977_v39, %v973_v37  ;;  %v942_v50 = vmax.f32 %v873_v40, 0.0  ;;  %v928_v51 = vadd.f32 %v927_v47, %v804_v3  ;;  %v877_v52 = vadd.f32 %v876_v48, %v809_v5  ;;  %v929_v53 = vpop.f32.mrb[14].mxu1  ;;  %v878_v54 = vpop.f32.mrb[15].mxu0 }
 0x21d   : > { %v944_v56 = vmax.f32 %v926_v45, 0.0  ;;  %v943_v57 = vmax.f32 %v875_v46, 0.0  ;;  %v930_v58 = vadd.f32 %v929_v53, %v809_v5  ;;  %v879_v59 = vadd.f32 %v878_v54, %v809_v5  ;;  %v931_v60 = vpop.f32.mrb[15].mxu1 }
 0x21e   : > { %v978_v61 = vmul.f32 %v963_v55, %v942_v50  ;;  %v945_v62 = vmax.f32 %v928_v51, 0.0  ;;  %v946_v63 = vmax.f32 %v877_v52, 0.0  ;;  %v932_v0 = vadd.f32 %v931_v60, %v809_v5 }
 0x21f   : > { %v980_v6 = vmul.f32 %v963_v55, %v944_v56  ;;  %v979_v7 = vmul.f32 %v963_v55, %v943_v57  ;;  %v948_v8 = vmax.f32 %v930_v58, 0.0  ;;  %v947_v9 = vmax.f32 %v879_v59, 0.0 }
 0x220   : > { %v987_v1 = vadd.f32 %v986_v38, %v978_v61  ;;  %v981_v3 = vmul.f32 %v963_v55, %v945_v62  ;;  %v982_v10 = vmul.f32 %v968_v2, %v946_v63  ;;  %v949_v11 = vmax.f32 %v932_v0, 0.0  ;;  %v1025_v38 = vpop.permute.xlu0 %1024 }
 0x221   : > { %v1005_v12 = vadd.f32 %v1004_v43, %v980_v6  ;;  %v996_v13 = vadd.f32 %v995_v44, %v979_v7  ;;  %v984_v4 = vmul.f32 %v968_v2, %v948_v8  ;;  %v983_v14 = vmul.f32 %v968_v2, %v947_v9 }
 0x222   : > { %v1014_v16 = vadd.f32 %v1013_v49, %v981_v3  ;;  %v988_v17 = vadd.f32 %v987_v1, %v982_v10  ;;  %v985_v18 = vmul.f32 %v968_v2, %v949_v11  ;;  %v1286_v31 = vmov 1966171168  }
 0x223   : > { %v1006_v19 = vadd.f32 %v1005_v12, %v984_v4  ;;  %v997_v20 = vadd.f32 %v996_v13, %v983_v14  ;;  %v1042_v32 = vunpack.c.l.s4 %v1286_v31  ;;  %v1029_v35 = vsub.s32 0, %v1028_v24 }
 0x224   : > { %v989_v5 = vrot.slane %v988_v17, 4  ;;  %v1015_v21 = vadd.f32 %v1014_v16, %v985_v18  ;;  %vm1066_vm2 = vcmp.lt.s32.totalorder %v1027_v15, 512 }
 0x225   : > { %v1007_v22 = vrot.slane %v1006_v19, 4  ;;  %v998_v23 = vrot.slane %v997_v20, 4  ;;  %v1043_v43 = vunpack.c.0.s8 %v1042_v32  ;;  %v1030_v46 = vrot.slane %v1025_v38, %v1029_v35 }
 0x226   : > { %v990_v25 = vadd.f32 %v989_v5, %v988_v17  ;;  %v1016_v26 = vrot.slane %v1015_v21, 4 }
 0x227   : > { %v1008_v27 = vadd.f32 %v1007_v22, %v1006_v19  ;;  %v999_v28 = vadd.f32 %v998_v23, %v997_v20  ;;  %v1046_v53 = vsub.s32 %v1043_v43, %v1028_v24 }
 0x228   : > { %v991_v29 = vrot.slane %v990_v25, 2  ;;  %v1017_v30 = vadd.f32 %v1016_v26, %v1015_v21 }
 0x229   : > { %v1009_v33 = vrot.slane %v1008_v27, 2  ;;  %v1000_v34 = vrot.slane %v999_v28, 2 }
 0x22a   : > { %v992_v36 = vadd.f32 %v991_v29, %v990_v25  ;;  %v1018_v37 = vrot.slane %v1017_v30, 2 }
 0x22b   : > { %v1010_v39 = vadd.f32 %v1009_v33, %v1008_v27  ;;  %v1001_v40 = vadd.f32 %v1000_v34, %v999_v28 }
 0x22c   : > { %v993_v41 = vrot.slane %v992_v36, 1  ;;  %v1019_v42 = vadd.f32 %v1018_v37, %v1017_v30 }
 0x22d   : > { %v1011_v44 = vrot.slane %v1010_v39, 1  ;;  %v1002_v45 = vrot.slane %v1001_v40, 1 }
 0x22e   : > { %v994_v47 = vadd.f32 %v993_v41, %v992_v36  ;;  %v1020_v48 = vrot.slane %v1019_v42, 1 }
 0x22f   : > { %v1012_v49 = vadd.f32 %v1011_v44, %v1010_v39  ;;  %v1003_v50 = vadd.f32 %v1002_v45, %v1001_v40 }
 0x230   : > { %v1031_v51 = vadd.f32 %v1030_v46, %v994_v47  ;;  %v1021_v52 = vadd.f32 %v1020_v48, %v1019_v42 }
 0x231   : > { %v1033_v54 = vadd.f32 %v1030_v46, %v1012_v49  ;;  %v1032_v55 = vadd.f32 %v1030_v46, %v1003_v50 }
 0x232   : > { %v1034_v56 = vadd.f32 %v1030_v46, %v1021_v52 }
 0x233   : > { %v1039_v57 = vcombine.low %v1031_v51, %v1032_v55 }
 0x234   : > { %v1040_v58 = vcombine.low %v1033_v54, %v1034_v56 }
 0x235   : > { %v1047_v59 = vrot.slane %v1039_v57, %v1046_v53 }
 0x236   : > { %v1054_v60 = vrot.slane %v1040_v58, %v1046_v53 }
 0x238   : > { %v1055_v61 = vcombine.low %v1047_v59, %v1054_v60 }
 0x23a   : > { %v1062_v62 = vrot.slane %v1055_v61, %v1046_v53 }
 0x23c   : > { %1068 = vst.msk [vmem:[%s280_s27] sm:$0xf] %vm1066_vm2, %v1062_v62 }
 0x23d PF: > { %s19_s26 = sadd.s32 1, %s1283_s26  }
 0x23e   : > { %p16_p5 = scmp.ge.s32.totalorder %s19_s26, 4  }
 0x240   :  { %18 = sbr.rel (!%p16_p5) target bundleno = 3 (0x3), region = 78 }

</bundles_post_ra>
